<compile_context>
chip_gen: v6e
topology: v6e:2x2x1
jax: 0.10.0
libtpu: 0.0.40
codegen_flags: <defaults>
</compile_context>

<pallas_src>
import functools

import jax
import jax.numpy as jnp
from jax.experimental import pallas as pl
from jax.experimental.pallas import tpu as pltpu

INPUT_SIZE = 10
HIDDEN_SIZE = 5
OUTPUT_SIZE = 1


def _round_up(n, m):
    return ((n + m - 1) // m) * m


def _vmem_budget():
    """(vmem_limit_bytes, max batch rows per grid step), per TPU generation."""
    try:
        cap = getattr(pltpu.get_tpu_info(), "vmem_capacity_bytes", None)
    except Exception:
        cap = None
    if cap is None:
        cap = 64 << 20  # assume v7x-sized VMEM if the query is unavailable
    if cap >= (96 << 20):        # v5e / v6e: 128 MiB physical VMEM per core
        return 56 << 20, 24576
    return 40 << 20, 16384       # v7x: 64 MiB physical VMEM per TensorCore


def _mlp_kernel(b_total, tb, w1_ref, b1_ref, w2_ref, b2_ref, x_ref, o_ref):
    # x_ref: (tb, INPUT_SIZE) -- the model's native row-major layout (one contiguous
    # tb*40-byte chunk of HBM per grid step; no wrapper-side transpose/pad).
    x = x_ref[...]

    # fc1 fused with the layout change: contract the feature axis of both operands
    # (hT = W1 @ x^T, i.e. pl.dot(w1, x, trans_b=True)).  The MXU consumes x's minor
    # dim directly and the result (HIDDEN, tb) is feature-major => batch on lanes.
    h = jax.lax.dot_general(
        w1_ref[...], x,
        dimension_numbers=(((1,), (1,)), ((), ())),
        preferred_element_type=jnp.float32,
    )
    h = jnp.maximum(h + b1_ref[...], 0.0)          # bias (H, 1) broadcasts over lanes

    # fc2: (O, H) @ (H, tb) -> (O, tb); stays lane-dense all the way to the output DMA.
    y = jnp.dot(w2_ref[...], h, preferred_element_type=jnp.float32) + b2_ref[...]

    if b_total % tb != 0:
        # Tail block: rows past b_total were never DMA'd in (stale VMEM).  Their
        # columns are clipped on writeback anyway, but zero them so the tail is
        # fully defined (addresses the review's correctness note).
        lane = jax.lax.broadcasted_iota(jnp.int32, y.shape, dimension=1)
        valid = b_total - pl.program_id(0) * tb
        y = jnp.where(lane < valid, y, 0.0)

    o_ref[...] = y.astype(o_ref.dtype)


@jax.jit
def gnn_forward(x, w1, b1, w2, b2):
    """x: [..., INPUT_SIZE]; w1: [H, I]; b1: [H]; w2: [O, H]; b2: [O] (PyTorch layout)."""
    lead = x.shape[:-1]
    x2 = x.reshape(-1, INPUT_SIZE)       # contiguous reshape: no data movement
    B = x2.shape[0]

    vmem_limit, tb_cap = _vmem_budget()

    if B <= 512:
        # One exact block (block shape == full array dims), no tail handling needed.
        tb = B
    else:
        # Large, lane-aligned tile; keep >= 2 grid steps so both TensorCores (v7x
        # megacore) issue DMAs, and cap by the per-generation VMEM budget.
        tb = min(tb_cap, max(512, _round_up(pl.cdiv(B, 2), 128)))
    grid = (pl.cdiv(B, tb),)

    b1c = b1.reshape(HIDDEN_SIZE, 1).astype(jnp.float32)
    b2c = b2.reshape(OUTPUT_SIZE, 1).astype(jnp.float32)

    kernel = functools.partial(_mlp_kernel, B, tb)

    cost = pl.CostEstimate(
        flops=2 * B * (INPUT_SIZE * HIDDEN_SIZE + HIDDEN_SIZE * OUTPUT_SIZE),
        transcendentals=0,
        bytes_accessed=4 * B * (INPUT_SIZE + OUTPUT_SIZE),
    )

    yT = pl.pallas_call(
        kernel,
        out_shape=jax.ShapeDtypeStruct((OUTPUT_SIZE, B), jnp.float32),
        grid_spec=pltpu.PrefetchScalarGridSpec(
            num_scalar_prefetch=0,
            grid=grid,
            in_specs=[
                # Weights / biases: full blocks, constant index -> VMEM-resident
                # across all grid steps (DMA'd once).
                pl.BlockSpec((HIDDEN_SIZE, INPUT_SIZE), lambda i: (0, 0)),
                pl.BlockSpec((HIDDEN_SIZE, 1), lambda i: (0, 0)),
                pl.BlockSpec((OUTPUT_SIZE, HIDDEN_SIZE), lambda i: (0, 0)),
                pl.BlockSpec((OUTPUT_SIZE, 1), lambda i: (0, 0)),
                # Activations: native [B, I] layout, tiled over batch rows only.
                pl.BlockSpec((tb, INPUT_SIZE), lambda i: (i, 0)),
            ],
            out_specs=pl.BlockSpec((OUTPUT_SIZE, tb), lambda i: (0, i)),
        ),
        compiler_params=pltpu.CompilerParams(
            dimension_semantics=("parallel",),
            vmem_limit_bytes=vmem_limit,
        ),
        cost_estimate=cost,
    )(w1, b1c, w2, b2c, x2)

    # (1, B) -> (B, 1): layout-free for OUTPUT_SIZE == 1; fused under jit.
    return yT.T.reshape(*lead, OUTPUT_SIZE)


def init_params(key):
    # PyTorch nn.Linear layout + uniform(-1/sqrt(fan_in), 1/sqrt(fan_in)) init.
    k1, k2, k3, k4 = jax.random.split(key, 4)
    bound1 = 1.0 / jnp.sqrt(jnp.float32(INPUT_SIZE))
    bound2 = 1.0 / jnp.sqrt(jnp.float32(HIDDEN_SIZE))
    w1 = jax.random.uniform(k1, (HIDDEN_SIZE, INPUT_SIZE), jnp.float32, -bound1, bound1)
    b1 = jax.random.uniform(k2, (HIDDEN_SIZE,), jnp.float32, -bound1, bound1)
    w2 = jax.random.uniform(k3, (OUTPUT_SIZE, HIDDEN_SIZE), jnp.float32, -bound2, bound2)
    b2 = jax.random.uniform(k4, (OUTPUT_SIZE,), jnp.float32, -bound2, bound2)
    return w1, b1, w2, b2


if __name__ == "__main__":
    key = jax.random.PRNGKey(0)
    pkey, xkey = jax.random.split(key)
    w1, b1, w2, b2 = init_params(pkey)

    def ref_forward(xx):
        # Pure-JAX reference (PyTorch semantics: y = relu(x @ W1.T + b1) @ W2.T + b2).
        return jnp.maximum(xx @ w1.T + b1, 0.0) @ w2.T + b2

    # Small demo batches: an exact tiny block, an exact 256-row block, and one case
    # that exercises the multi-step grid plus the clipped/masked tail (tb=1024, grid=2).
    for batch in (8, 256, 2000):
        x = jax.random.normal(jax.random.fold_in(xkey, batch),
                              (batch, INPUT_SIZE), jnp.float32)
        out = gnn_forward(x, w1, b1, w2, b2)
        jax.block_until_ready(out)
        ref = ref_forward(x)
        assert out.shape == (batch, OUTPUT_SIZE)
        assert jnp.allclose(out, ref, atol=2e-5, rtol=2e-5), f"mismatch at batch={batch}"

    print("KERNEL_OK")
</pallas_src>

<mosaic_0001>
module attributes {stable_mosaic.version = 11 : i64} {
  func.func @_mlp_kernel(%arg0: i32, %arg1: memref<5x10xf32, #tpu.memory_space<vmem>>, %arg2: memref<5x1xf32, #tpu.memory_space<vmem>>, %arg3: memref<1x5xf32, #tpu.memory_space<vmem>>, %arg4: memref<1x1xf32, #tpu.memory_space<vmem>>, %arg5: memref<8x10xf32, #tpu.memory_space<vmem>>, %arg6: memref<1x8xf32, #tpu.memory_space<vmem>>) attributes {dimension_semantics = [#tpu.dimension_semantics<parallel>], iteration_bounds = array<i64: 1>, scalar_prefetch = 0 : i64, scratch_operands = 0 : i64, tpu.core_type = #tpu.core_type<tc>, window_params = [{pipeline_mode = #tpu.pipeline_mode<synchronous>, transform_indices = @transform_0, window_bounds = array<i64: 5, 10>}, {pipeline_mode = #tpu.pipeline_mode<synchronous>, transform_indices = @transform_1, window_bounds = array<i64: 5, 1>}, {pipeline_mode = #tpu.pipeline_mode<synchronous>, transform_indices = @transform_2, window_bounds = array<i64: 1, 5>}, {pipeline_mode = #tpu.pipeline_mode<synchronous>, transform_indices = @transform_3, window_bounds = array<i64: 1, 1>}, {transform_indices = @transform_4, window_bounds = array<i64: 8, 10>}, {transform_indices = @transform_5, window_bounds = array<i64: 1, 8>}]} {
    %c0 = arith.constant 0 : index
    %c0_0 = arith.constant 0 : index
    %0 = vector.load %arg5[%c0, %c0_0] : memref<8x10xf32, #tpu.memory_space<vmem>>, vector<8x10xf32>
    %c0_1 = arith.constant 0 : index
    %c0_2 = arith.constant 0 : index
    %1 = vector.load %arg1[%c0_1, %c0_2] : memref<5x10xf32, #tpu.memory_space<vmem>>, vector<5x10xf32>
    %cst = arith.constant dense<0.000000e+00> : vector<5x8xf32>
    %2 = tpu.matmul %1, %0, %cst {dimension_numbers = #tpu.dot_dimension_numbers<[1], [1], [0], [0], [0, 0, 1, 0], [], []>} : vector<5x10xf32>, vector<8x10xf32>, vector<5x8xf32> -> vector<5x8xf32>
    %c0_3 = arith.constant 0 : index
    %c0_4 = arith.constant 0 : index
    %3 = vector.load %arg2[%c0_3, %c0_4] : memref<5x1xf32, #tpu.memory_space<vmem>>, vector<5x1xf32>
    %4 = vector.broadcast %3 : vector<5x1xf32> to vector<5x8xf32>
    %5 = arith.addf %2, %4 : vector<5x8xf32>
    %cst_5 = arith.constant 0.000000e+00 : f32
    %6 = vector.broadcast %cst_5 : f32 to vector<5x8xf32>
    %7 = arith.maximumf %5, %6 : vector<5x8xf32>
    %c0_6 = arith.constant 0 : index
    %c0_7 = arith.constant 0 : index
    %8 = vector.load %arg3[%c0_6, %c0_7] : memref<1x5xf32, #tpu.memory_space<vmem>>, vector<1x5xf32>
    %cst_8 = arith.constant dense<0.000000e+00> : vector<1x8xf32>
    %9 = tpu.matmul %8, %7, %cst_8 {dimension_numbers = #tpu.dot_dimension_numbers<[1], [0], [0], [1], [0, 0, 1, 1], [], []>} : vector<1x5xf32>, vector<5x8xf32>, vector<1x8xf32> -> vector<1x8xf32>
    %c0_9 = arith.constant 0 : index
    %c0_10 = arith.constant 0 : index
    %10 = vector.load %arg4[%c0_9, %c0_10] : memref<1x1xf32, #tpu.memory_space<vmem>>, vector<1x1xf32>
    %11 = vector.broadcast %10 : vector<1x1xf32> to vector<1x8xf32>
    %12 = arith.addf %9, %11 : vector<1x8xf32>
    %c0_11 = arith.constant 0 : index
    %c0_12 = arith.constant 0 : index
    %13 = vector.load %arg6[%c0_11, %c0_12] : memref<1x8xf32, #tpu.memory_space<vmem>>, vector<1x8xf32>
    tpu.vector_store %arg6[%c0_11, %c0_12], %12 {strides = array<i32>} : memref<1x8xf32, #tpu.memory_space<vmem>>, vector<1x8xf32>,
    return
  }
  func.func @transform_0(%arg0: i32) -> (i32, i32) {
    %c0_i32 = arith.constant 0 : i32
    %c0_i32_0 = arith.constant 0 : i32
    %c0_i32_1 = arith.constant 0 : i32
    return %c0_i32, %c0_i32_0 : i32, i32
  }
  func.func @transform_1(%arg0: i32) -> (i32, i32) {
    %c0_i32 = arith.constant 0 : i32
    %c0_i32_0 = arith.constant 0 : i32
    %c0_i32_1 = arith.constant 0 : i32
    return %c0_i32, %c0_i32_0 : i32, i32
  }
  func.func @transform_2(%arg0: i32) -> (i32, i32) {
    %c0_i32 = arith.constant 0 : i32
    %c0_i32_0 = arith.constant 0 : i32
    %c0_i32_1 = arith.constant 0 : i32
    return %c0_i32, %c0_i32_0 : i32, i32
  }
  func.func @transform_3(%arg0: i32) -> (i32, i32) {
    %c0_i32 = arith.constant 0 : i32
    %c0_i32_0 = arith.constant 0 : i32
    %c0_i32_1 = arith.constant 0 : i32
    return %c0_i32, %c0_i32_0 : i32, i32
  }
  func.func @transform_4(%arg0: i32) -> (i32, i32) {
    %c0_i32 = arith.constant 0 : i32
    %c0_i32_0 = arith.constant 0 : i32
    return %arg0, %c0_i32 : i32, i32
  }
  func.func @transform_5(%arg0: i32) -> (i32, i32) {
    %c0_i32 = arith.constant 0 : i32
    %c0_i32_0 = arith.constant 0 : i32
    return %c0_i32, %arg0 : i32, i32
  }
}

</mosaic_0001>

<bundles_post_ra>
// kernel: gnn_forward.1
= control target key start
LH: loop header
LB: loop body
LE: loop exit
PB: predicated region body
PF: predicated region fallthrough
CT: control target
= control target key end

     0   :  { %s311_s0 = inlined_call_operand.vmem [shape: f32[5,10], index: 0, kind: input, shape index: {}]   ;;  %s312_s1 = inlined_call_operand.vmem [shape: f32[5,1], index: 1, kind: input, shape index: {}]   ;;  %s313_s2 = inlined_call_operand.vmem [shape: f32[1,5], index: 2, kind: input, shape index: {}]   ;;  %s314_s3 = inlined_call_operand.<no memory space> [shape: f32[1,1], index: 3, kind: input, shape index: {}]   ;;  %s315_s4 = inlined_call_operand.vmem [shape: f32[8,10], index: 4, kind: input, shape index: {}]   ;;  %s316_s5 = inlined_call_operand.hbm [shape: f32[1,8], index: 5, kind: output, shape index: {}]  }
   0x1   :  { %v10_v0 = vstv %s314_s3 }
   0x2   :  { %11 = vst [vmem:[#allocation2] sm:$0x1] %v10_v0 }
   0x3   :  { %v23_v1 = vld [vmem:[%s315_s4] sm:$0xff]  ;;  %vm31_vm0 = vcmask 80896   ;;  %v259_v2 = vmov 0.0   ;;  %vm260_vm1 = vmmov 0   ;;  %v261_v5 = vmov 0  }
   0x4   :  { %222 = vmatprep.subr.mxu0 %v259_v2  ;;  %224 = vmatprep.mubr.msk.f32.mxu0 %vm260_vm1, %v259_v2  ;;  %v25_v3 = vld [vmem:[%s312_s1] sm:$0x1f] }
   0x5   :  { %223 = vmatpush3.xpose.msk.msra.mxu0 %vm31_vm0, %v23_v1  ;;  %v24_v4 = vld [vmem:[%s311_s0] sm:$0x1f]  ;;  %236 = vset.pattern.permute.xlu0 %v261_v5 }
   0x6   :  { %12 = vsyncpa [#allocation4], 0  ;;  %28 = vperm.xlu0 %236, %v25_v3   ;;  %227 = vmatprep.subr.mxu1 %v259_v2  ;;  %vm124_vm2 = vcmask 1044480   ;;  %v109_v12 = vld [vmem:[%s313_s2] sm:$0x1]  ;;  %vm120_vm3 = vcmask 39936   ;;  %v116_v13 = vlaneseq }
   0x7   :  { %229 = vmatprep.mubr.msk.f32.mxu1 %vm260_vm1, %v259_v2  ;;  %s262_s0 = smov [#allocation3]   ;;  %vm198_vm4 = vcmask 57344  }
   0x8   :  { %225 = vmatmul.mubr.msk.f32.vlgmr.msra.gmra.mxu0 %vm31_vm0, %v24_v4  ;;  %v117_v14 = vshrl.u32 %v116_v13, 7  ;;  %s206_s4 = sshll.u32 %s262_s0, 4  ;;  %s207_s4 = int_to_ptr.vmem [resolvable:$true] %s206_s4 }
   0x9   :  { %v110_v6 = vld [vmem:[#allocation2] sm:$0x1]  ;;  %s237_s26 = scalar_lea.vmem %s207_s4, 16  ;;  %s241_s27 = scalar_lea.vmem %s207_s4, 32 }
   0xa   :  { %113 = vperm.xlu0 %236, %v110_v6   ;;  %v118_v15 = vsub.s32 0, %v117_v14  ;;  %p238_p0 = scmp.ne.s32.totalorder %s207_s4, %s237_s26  ;;  %p242_p1 = scmp.lt.s32.totalorder %s207_s4, %s207_s4 }
   0xb   :  { %p243_p2 = scmp.lt.s32.totalorder %s241_s27, %s237_s26 }
   0xd   :  { %p244_p3 = por %p243_p2, %p242_p1 }
   0xf   :  { %p245_p4 = pnand %p244_p3, %p238_p0 }
  0x81   :  { %v29_v7 = vpop.permute.xlu0 %28 }
  0x85   :  { %v114_v16 = vpop.permute.xlu0 %113 }
  0x86   :  { %v119_v17 = vrot.slane %v114_v16, %v118_v15 }
  0xc8   :  { %v104_v8 = vpop.f32.mrf.mxu0 }
  0xc9   :  { %v105_v9 = vadd.f32 %v104_v8, %v29_v7 }
  0xca   :  { %v226_v10 = vpop.f32.mrf.mxu0 }
  0xcb   :  { %v108_v11 = vmax.f32 %v105_v9, 0.0 }
  0xcd   :  { %228 = vmatpush3.msk.msra.mxu1 %vm124_vm2, %v108_v11 }
  0xce   :  { %230 = vmatmul.mubr.msk.f32.vlgmr.msra.gmra.mxu1 %vm120_vm3, %v109_v12 }
 0x18e   :  { %v194_v18 = vpop.f32.mrf.mxu1 }
 0x18f   :  { %v195_v19 = vadd.f32 %v194_v18, %v119_v17 }
 0x190   :  { %v231_v20 = vpop.f32.mrf.mxu1 }
 0x191   :  { %199 = vst.msk [vmem:[#allocation3] sm:$0x1] %vm198_vm4, %v195_v19 }
 0x192   :  { %248 = shalt.err (!%p245_p4)
}
 0x193   :  { %209 = dma.vmem_to_hbm [thread:$0]  %s207_s4, 16, %s316_s5, [#allocation4]  }
 0x194   :  { %257 = dma.done.wait [#allocation4], 16  }
 0x195   :  { %258 = vsyncadd [#allocation4], 4294967280 }
 0x196   :  { %213 = vsyncpa [#allocation4], 1 }

</bundles_post_ra>
